<compile_context>
chip_gen: v7x
topology: tpu7x:2x2x1
jax: 0.10.0
libtpu: 0.0.40
codegen_flags: <defaults>
</compile_context>

<pallas_src>
import jax
import jax.numpy as jnp
from jax.experimental import pallas as pl
from jax.experimental.pallas import tpu as pltpu

HIDDEN = 128        # hidden_size (768 in the torch default; lane-aligned here)
BATCH = 256         # many rows per call -> fills MXU rows, amortizes launch
NUM_CLASSES = 2
LANE = 128          # pad the tiny N=2 classifier up to a full lane tile
TM = 128            # batch-tile rows per grid step (multiple of 128 for v5e MXU)


# ----------------------------------------------------------------------------
# Fused kernel: linear -> tanh -> linear (lane-dense padded output)
# ----------------------------------------------------------------------------
def _nsp_kernel(x_ref, w1_ref, b1_ref, w2_ref, b2_ref, o_ref):
    # bf16 x bf16 -> f32 accumulator on the MXU.
    h = jnp.dot(x_ref[...], w1_ref[...], preferred_element_type=jnp.float32)
    h = jnp.tanh(h + b1_ref[...])                       # f32 bias add + EUP tanh
    # Second matmul on the bf16 MXU path, f32 accumulate, f32 bias add.
    o = jnp.dot(h.astype(w2_ref.dtype), w2_ref[...],
                preferred_element_type=jnp.float32) + b2_ref[...]
    o_ref[...] = o.astype(o_ref.dtype)


# ----------------------------------------------------------------------------
# One-time parameter preparation (model-init time, NOT on the forward path).
# ----------------------------------------------------------------------------
def prepare_nsp_params(w1, b1, w2, b2):
    """w1:(H,H), b1:(H,), w2:(H,2), b2:(2,) -> padded / bf16-cast params."""
    H = w1.shape[0]
    n = w2.shape[1]
    w1_bf = w1.astype(jnp.bfloat16)
    b1r = b1[None, :].astype(jnp.float32)                            # (1, H)
    w2p = jnp.zeros((H, LANE), jnp.bfloat16).at[:, :n].set(
        w2.astype(jnp.bfloat16))                                     # (H, 128)
    b2p = jnp.zeros((1, LANE), jnp.float32).at[:, :n].set(
        b2[None, :].astype(jnp.float32))                             # (1, 128)
    return (w1_bf, b1r, w2p, b2p)


# ----------------------------------------------------------------------------
# Forward wrapper: only a cast + one pallas_call (+ final slice to (B, 2)).
# ----------------------------------------------------------------------------
def next_sentence_prediction(x, params):
    """x:(B,H) f32/bf16, params from prepare_nsp_params  ->  logits (B, 2)."""
    w1_bf, b1r, w2p, b2p = params
    B, H = x.shape
    assert B % TM == 0, "pad the batch to a multiple of TM outside the hot path"

    xb = x.astype(jnp.bfloat16)   # halves HBM->VMEM bytes for activations

    # Advisory cost so XLA can overlap this tiny call with surrounding ops.
    flops = 2 * B * H * H + 2 * B * H * LANE
    bytes_accessed = (xb.size * 2 + w1_bf.size * 2 + w2p.size * 2
                      + b1r.size * 4 + b2p.size * 4 + B * LANE * 4)
    cost = pl.CostEstimate(flops=flops, transcendentals=B * H,
                           bytes_accessed=bytes_accessed)

    out_padded = pl.pallas_call(
        _nsp_kernel,
        out_shape=jax.ShapeDtypeStruct((B, LANE), jnp.float32),
        grid_spec=pltpu.PrefetchScalarGridSpec(
            num_scalar_prefetch=0,
            grid=(B // TM,),
            in_specs=[
                pl.BlockSpec((TM, H), lambda i: (i, 0)),      # x tile (pipelined)
                pl.BlockSpec((H, H), lambda i: (0, 0)),       # W1 (resident)
                pl.BlockSpec((1, H), lambda i: (0, 0)),       # b1 (resident)
                pl.BlockSpec((H, LANE), lambda i: (0, 0)),    # W2 padded (resident)
                pl.BlockSpec((1, LANE), lambda i: (0, 0)),    # b2 padded (resident)
            ],
            out_specs=pl.BlockSpec((TM, LANE), lambda i: (i, 0)),
        ),
        compiler_params=pltpu.CompilerParams(
            dimension_semantics=("parallel",)),
        cost_estimate=cost,
    )(xb, w1_bf, b1r, w2p, b2p)

    # Downstream consumers that can read the lane-padded slab should do so and
    # skip this slice entirely; it is kept here to match the module's (B, 2).
    return out_padded[:, :NUM_CLASSES]


# ----------------------------------------------------------------------------
if __name__ == "__main__":
    key = jax.random.PRNGKey(0)
    kx, kw1, kb1, kw2, kb2 = jax.random.split(key, 5)

    x = jax.random.normal(kx, (BATCH, HIDDEN), jnp.float32)
    w1 = jax.random.normal(kw1, (HIDDEN, HIDDEN), jnp.float32) * 0.02
    b1 = jax.random.normal(kb1, (HIDDEN,), jnp.float32) * 0.02
    w2 = jax.random.normal(kw2, (HIDDEN, NUM_CLASSES), jnp.float32) * 0.02
    b2 = jax.random.normal(kb2, (NUM_CLASSES,), jnp.float32) * 0.02

    # One-time prep (outside the jit'd forward path).
    params = prepare_nsp_params(w1, b1, w2, b2)
    params = jax.tree_util.tree_map(jax.block_until_ready, params)

    fwd = jax.jit(lambda xx: next_sentence_prediction(xx, params))
    logits = jax.block_until_ready(fwd(x))

    # Reference (pure JAX, f32) check of the fused bf16-input kernel.
    ref = jnp.tanh(x @ w1 + b1[None, :]) @ w2 + b2[None, :]
    assert logits.shape == (BATCH, NUM_CLASSES)
    assert jnp.allclose(logits, ref, atol=2e-2, rtol=2e-2)

    print("KERNEL_OK")
</pallas_src>

<mosaic_0001>
module attributes {stable_mosaic.version = 11 : i64} {
  func.func @_nsp_kernel(%arg0: i32, %arg1: memref<128x128xbf16, #tpu.memory_space<vmem>>, %arg2: memref<128x128xbf16, #tpu.memory_space<vmem>>, %arg3: memref<1x128xf32, #tpu.memory_space<vmem>>, %arg4: memref<128x128xbf16, #tpu.memory_space<vmem>>, %arg5: memref<1x128xf32, #tpu.memory_space<vmem>>, %arg6: memref<128x128xf32, #tpu.memory_space<vmem>>) attributes {dimension_semantics = [#tpu.dimension_semantics<parallel>], iteration_bounds = array<i64: 2>, scalar_prefetch = 0 : i64, scratch_operands = 0 : i64, tpu.core_type = #tpu.core_type<tc>, window_params = [{transform_indices = @transform_0, window_bounds = array<i64: 128, 128>}, {pipeline_mode = #tpu.pipeline_mode<synchronous>, transform_indices = @transform_1, window_bounds = array<i64: 128, 128>}, {pipeline_mode = #tpu.pipeline_mode<synchronous>, transform_indices = @transform_2, window_bounds = array<i64: 1, 128>}, {pipeline_mode = #tpu.pipeline_mode<synchronous>, transform_indices = @transform_3, window_bounds = array<i64: 128, 128>}, {pipeline_mode = #tpu.pipeline_mode<synchronous>, transform_indices = @transform_4, window_bounds = array<i64: 1, 128>}, {transform_indices = @transform_5, window_bounds = array<i64: 128, 128>}]} {
    %c0 = arith.constant 0 : index
    %c0_0 = arith.constant 0 : index
    %0 = vector.load %arg1[%c0, %c0_0] : memref<128x128xbf16, #tpu.memory_space<vmem>>, vector<128x128xbf16>
    %c0_1 = arith.constant 0 : index
    %c0_2 = arith.constant 0 : index
    %1 = vector.load %arg2[%c0_1, %c0_2] : memref<128x128xbf16, #tpu.memory_space<vmem>>, vector<128x128xbf16>
    %cst = arith.constant dense<0.000000e+00> : vector<128x128xf32>
    %2 = tpu.matmul %0, %1, %cst {dimension_numbers = #tpu.dot_dimension_numbers<[1], [0], [0], [1], [0, 0, 1, 1], [], []>} : vector<128x128xbf16>, vector<128x128xbf16>, vector<128x128xf32> -> vector<128x128xf32>
    %c0_3 = arith.constant 0 : index
    %c0_4 = arith.constant 0 : index
    %3 = vector.load %arg3[%c0_3, %c0_4] : memref<1x128xf32, #tpu.memory_space<vmem>>, vector<1x128xf32>
    %4 = vector.broadcast %3 : vector<1x128xf32> to vector<128x128xf32>
    %5 = arith.addf %2, %4 : vector<128x128xf32>
    %6 = math.tanh %5 : vector<128x128xf32>
    %7 = arith.truncf %6 : vector<128x128xf32> to vector<128x128xbf16>
    %c0_5 = arith.constant 0 : index
    %c0_6 = arith.constant 0 : index
    %8 = vector.load %arg4[%c0_5, %c0_6] : memref<128x128xbf16, #tpu.memory_space<vmem>>, vector<128x128xbf16>
    %cst_7 = arith.constant dense<0.000000e+00> : vector<128x128xf32>
    %9 = tpu.matmul %7, %8, %cst_7 {dimension_numbers = #tpu.dot_dimension_numbers<[1], [0], [0], [1], [0, 0, 1, 1], [], []>} : vector<128x128xbf16>, vector<128x128xbf16>, vector<128x128xf32> -> vector<128x128xf32>
    %c0_8 = arith.constant 0 : index
    %c0_9 = arith.constant 0 : index
    %10 = vector.load %arg5[%c0_8, %c0_9] : memref<1x128xf32, #tpu.memory_space<vmem>>, vector<1x128xf32>
    %11 = vector.broadcast %10 : vector<1x128xf32> to vector<128x128xf32>
    %12 = arith.addf %9, %11 : vector<128x128xf32>
    %c0_10 = arith.constant 0 : index
    %c0_11 = arith.constant 0 : index
    %13 = vector.load %arg6[%c0_10, %c0_11] : memref<128x128xf32, #tpu.memory_space<vmem>>, vector<128x128xf32>
    tpu.vector_store %arg6[%c0_10, %c0_11], %12 {strides = array<i32>} : memref<128x128xf32, #tpu.memory_space<vmem>>, vector<128x128xf32>,
    return
  }
  func.func @transform_0(%arg0: i32) -> (i32, i32) {
    %c0_i32 = arith.constant 0 : i32
    %c0_i32_0 = arith.constant 0 : i32
    return %arg0, %c0_i32 : i32, i32
  }
  func.func @transform_1(%arg0: i32) -> (i32, i32) {
    %c0_i32 = arith.constant 0 : i32
    %c0_i32_0 = arith.constant 0 : i32
    %c0_i32_1 = arith.constant 0 : i32
    return %c0_i32, %c0_i32_0 : i32, i32
  }
  func.func @transform_2(%arg0: i32) -> (i32, i32) {
    %c0_i32 = arith.constant 0 : i32
    %c0_i32_0 = arith.constant 0 : i32
    %c0_i32_1 = arith.constant 0 : i32
    return %c0_i32, %c0_i32_0 : i32, i32
  }
  func.func @transform_3(%arg0: i32) -> (i32, i32) {
    %c0_i32 = arith.constant 0 : i32
    %c0_i32_0 = arith.constant 0 : i32
    %c0_i32_1 = arith.constant 0 : i32
    return %c0_i32, %c0_i32_0 : i32, i32
  }
  func.func @transform_4(%arg0: i32) -> (i32, i32) {
    %c0_i32 = arith.constant 0 : i32
    %c0_i32_0 = arith.constant 0 : i32
    %c0_i32_1 = arith.constant 0 : i32
    return %c0_i32, %c0_i32_0 : i32, i32
  }
  func.func @transform_5(%arg0: i32) -> (i32, i32) {
    %c0_i32 = arith.constant 0 : i32
    %c0_i32_0 = arith.constant 0 : i32
    return %arg0, %c0_i32 : i32, i32
  }
}

</mosaic_0001>

<bundles_post_ra>
// kernel: _lambda_.1
= control target key start
LH: loop header
LB: loop body
LE: loop exit
PB: predicated region body
PF: predicated region fallthrough
CT: control target
= control target key end

     0   :  { %s960_s18 = smov 0   ;;  %s1063_s0 = inlined_call_operand.vmem [shape: bf16[256,128], index: 0, kind: input, shape index: {}]   ;;  %s1064_s1 = inlined_call_operand.vmem [shape: bf16[128,128], index: 1, kind: input, shape index: {}]   ;;  %s1065_s2 = inlined_call_operand.vmem [shape: f32[1,128], index: 2, kind: input, shape index: {}]   ;;  %s1066_s3 = inlined_call_operand.vmem [shape: bf16[128,128], index: 3, kind: input, shape index: {}]   ;;  %s1067_s4 = inlined_call_operand.vmem [shape: f32[1,128], index: 4, kind: input, shape index: {}]   ;;  %s1068_s5 = inlined_call_operand.vmem [shape: f32[256,128], index: 5, kind: output, shape index: {}]  }
   0x1 LB: > { %s725_s19 = sadd.s32 4294967295, %s928_s18   ;;  %p729_p0 = scmp.ge.s32.totalorder %s928_s18, 1  ;;  %s928_s18 = sphi %s960_s18, %s15_s18  }
   0x2   : > { %p188_p1 = scmp.lt.s32.totalorder %s928_s18, 3 }
   0x4   : > { %p189_p2 = pnand %p729_p0, %p188_p1 }
   0x5   : > { %v866_v0 = vld [vmem:[%s1064_s1] sm:$0xff] (!%p189_p2)   ;;  %s730_s22 = sshll.u32 (!%p189_p2), %s725_s19, 4  ;;  %v867_v1 = vld [vmem:[%s1064_s1 + $0x8] sm:$0xff] (!%p189_p2)   ;;  %v868_v2 = vld [vmem:[%s1064_s1 + $0x10] sm:$0xff] (!%p189_p2)  }
   0x6   : > { %192 = sbr.rel (%p189_p2) target bundleno = 511 (0x1ff), region = 40  ;;  %p217_p3 = scmp.lt.s32.totalorder (!%p189_p2), %s730_s22, 31  ;;  %794 = vmatprep.subr.bf16.mxu0 (!%p189_p2), %v866_v0  ;;  %v869_v3 = vld [vmem:[%s1064_s1 + $0x18] sm:$0xff] (!%p189_p2)   ;;  %v870_v5 = vld [vmem:[%s1064_s1 + $0x20] sm:$0xff] (!%p189_p2)   ;;  %v871_v6 = vld [vmem:[%s1064_s1 + $0x28] sm:$0xff] (!%p189_p2)  }
   0x7   : > { %795 = vmatpush3.bf16.msra.mxu0 (!%p189_p2), %v866_v0  ;;  %v882_v7 = vld [vmem:[%s1066_s3] sm:$0xff] (!%p189_p2)   ;;  %v883_v8 = vld [vmem:[%s1066_s3 + $0x8] sm:$0xff] (!%p189_p2)   ;;  %v872_v9 = vld [vmem:[%s1064_s1 + $0x30] sm:$0xff] (!%p189_p2)  }
   0x8   : > { %796 = vmatprep.subr.bf16.mxu0 (!%p189_p2), %v867_v1  ;;  %826 = vmatprep.subr.bf16.mxu1 (!%p189_p2), %v882_v7  ;;  %v884_v10 = vld [vmem:[%s1066_s3 + $0x10] sm:$0xff] (!%p189_p2)   ;;  %v873_v11 = vld [vmem:[%s1064_s1 + $0x38] sm:$0xff] (!%p189_p2)   ;;  %v886_v20 = vld [vmem:[%s1066_s3 + $0x20] sm:$0xff] (!%p189_p2)  }
   0x9   : > { %827 = vmatpush3.bf16.msra.mxu1 (!%p189_p2), %v882_v7  ;;  %v885_v19 = vld [vmem:[%s1066_s3 + $0x18] sm:$0xff] (!%p189_p2)   ;;  %v887_v21 = vld [vmem:[%s1066_s3 + $0x28] sm:$0xff] (!%p189_p2)   ;;  %v888_v22 = vld [vmem:[%s1066_s3 + $0x30] sm:$0xff] (!%p189_p2)  }
   0xa   : > { %828 = vmatprep.subr.bf16.mxu1 (!%p189_p2), %v883_v8  ;;  %v889_v23 = vld [vmem:[%s1066_s3 + $0x38] sm:$0xff] (!%p189_p2)   ;;  %v734_v24 = vld [vmem:[%s1065_s2] ss:$0 sm:$0xff] (!%p189_p2) }
   0xb   : > { %797 = vmatpush3.bf16.msra.mxu0 (!%p189_p2), %v867_v1 }
   0xc   : > { %798 = vmatprep.subr.bf16.mxu0 (!%p189_p2), %v868_v2 }
   0xd   : > { %s1070_s22 = smov (!%p217_p3, %s730_s22), 31  ;;  %829 = vmatpush3.bf16.msra.mxu1 %v883_v8 }
   0xe   : > { %s731_s27 = sshll.u32 %s1070_s22, 2  ;;  %830 = vmatprep.subr.bf16.mxu1 %v884_v10  ;;  %s733_s11 = sshll.u32 %s1070_s22, 3 }
   0xf   : > { %s983_s30 = scalar_lea.vmem %s1063_s0, %s731_s27  ;;  %799 = vmatpush3.bf16.msra.mxu0 %v868_v2  ;;  %s1042_s16 = scalar_lea.vmem %s1068_s5, %s733_s11 }
  0x10   : > { %v874_v4 = vld [vmem:[%s983_s30] sm:$0xff]   ;;  %800 = vmatprep.subr.bf16.mxu0 %v869_v3  ;;  %v875_v12 = vld [vmem:[%s983_s30 + $0x8] sm:$0xff]   ;;  %v876_v13 = vld [vmem:[%s983_s30 + $0x10] sm:$0xff]  }
  0x11   : > { %810 = vmatprep.mubr.bf16.mxu0 %v874_v4  ;;  %831 = vmatpush3.bf16.msra.mxu1 %v884_v10  ;;  %v877_v14 = vld [vmem:[%s983_s30 + $0x18] sm:$0xff]   ;;  %v878_v15 = vld [vmem:[%s983_s30 + $0x20] sm:$0xff]   ;;  %v879_v16 = vld [vmem:[%s983_s30 + $0x28] sm:$0xff]  }
  0x12   : > { %v880_v17 = vld [vmem:[%s983_s30 + $0x30] sm:$0xff]   ;;  %v881_v18 = vld [vmem:[%s983_s30 + $0x38] sm:$0xff]   ;;  %832 = vmatprep.subr.bf16.mxu1 %v885_v19 }
  0x13   : > { %801 = vmatpush3.bf16.msra.mxu0 %v869_v3 }
  0x14   : > { %802 = vmatprep.subr.bf16.mxu0 %v870_v5 }
  0x15   : > { %833 = vmatpush3.bf16.msra.mxu1 %v885_v19 }
  0x16   : > { %834 = vmatprep.subr.bf16.mxu1 %v886_v20 }
  0x17   : > { %803 = vmatpush3.bf16.msra.mxu0 %v870_v5 }
  0x18   : > { %804 = vmatprep.subr.bf16.mxu0 %v871_v6 }
  0x19   : > { %835 = vmatpush3.bf16.msra.mxu1 %v886_v20 }
  0x1a   : > { %836 = vmatprep.subr.bf16.mxu1 %v887_v21 }
  0x1b   : > { %805 = vmatpush3.bf16.msra.mxu0 %v871_v6 }
  0x1c   : > { %806 = vmatprep.subr.bf16.mxu0 %v872_v9 }
  0x1d   : > { %837 = vmatpush3.bf16.msra.mxu1 %v887_v21 }
  0x1e   : > { %838 = vmatprep.subr.bf16.mxu1 %v888_v22 }
  0x1f   : > { %807 = vmatpush3.bf16.msra.mxu0 %v872_v9 }
  0x20   : > { %808 = vmatprep.subr.bf16.mxu0 %v873_v11 }
  0x21   : > { %839 = vmatpush3.bf16.msra.mxu1 %v888_v22 }
  0x22   : > { %840 = vmatprep.subr.bf16.mxu1 %v889_v23 }
  0x23   : > { %809 = vmatpush3.bf16.msra.mxu0 %v873_v11 }
  0x25   : > { %841 = vmatpush3.bf16.msra.mxu1 %v889_v23 }
  0x26   : > { %811 = vmatmul.mubr.bf16.vlgmr.msra.gmra.mrb[0].mxu0 %v875_v12 }
  0x27   : > { %814 = vmatprep.mubr.bf16.mxu0 %v876_v13 }
  0x2e   : > { %815 = vmatmul.mubr.bf16.gmra.mrb[4].mxu0 %v877_v14 }
  0x2f   : > { %818 = vmatprep.mubr.bf16.mxu0 %v878_v15 }
  0x36   : > { %819 = vmatmul.mubr.bf16.gmra.mrb[8].mxu0 %v879_v16 }
  0x37   : > { %822 = vmatprep.mubr.bf16.mxu0 %v880_v17  ;;  %v751_v17 = vld [vmem:[%s1067_s4] ss:$0 sm:$0xff] }
  0x3e   : > { %823 = vmatmul.mubr.bf16.gmra.mrb[12].mxu0 %v881_v18 }
  0xf9   : > { %v812_v25 = vpop.f32.mrb[0].mxu0 }
  0xfa   : > { %v407_v26 = vadd.f32 %v812_v25, %v734_v24  ;;  %v398_v27 = vpop.f32.mrb[1].mxu0 }
  0xfb   : > { %v399_v28 = vadd.f32 %v734_v24, %v398_v27  ;;  %v813_v29 = vpop.f32.mrb[2].mxu0 }
  0xfc   : > { %890 = vtanh.f32 %v407_v26  ;;  %v410_v30 = vadd.f32 %v813_v29, %v734_v24  ;;  %v401_v31 = vpop.f32.mrb[3].mxu0 }
  0xfd   : > { %892 = vtanh.f32 %v399_v28  ;;  %v402_v32 = vadd.f32 %v734_v24, %v401_v31 }
  0xfe   : > { %894 = vtanh.f32 %v410_v30 }
  0xff   : > { %896 = vtanh.f32 %v402_v32 }
 0x101   : > { %v816_v33 = vpop.f32.mrb[4].mxu0 }
 0x102   : > { %v423_v34 = vadd.f32 %v816_v33, %v734_v24  ;;  %v414_v35 = vpop.f32.mrb[5].mxu0 }
 0x103   : > { %v415_v36 = vadd.f32 %v734_v24, %v414_v35  ;;  %v817_v37 = vpop.f32.mrb[6].mxu0 }
 0x104   : > { %898 = vtanh.f32 %v423_v34  ;;  %v426_v38 = vadd.f32 %v817_v37, %v734_v24  ;;  %v417_v39 = vpop.f32.mrb[7].mxu0 }
 0x105   : > { %900 = vtanh.f32 %v415_v36  ;;  %v418_v40 = vadd.f32 %v734_v24, %v417_v39 }
 0x106   : > { %v891_v41 = vpop.eup %890  ;;  %902 = vtanh.f32 %v426_v38 }
 0x107   : > { %v893_v42 = vpop.eup %892  ;;  %904 = vtanh.f32 %v418_v40 }
 0x108   : > { %v895_v43 = vpop.eup %894 }
 0x109   : > { %v897_v44 = vpop.eup %896  ;;  %v820_v45 = vpop.f32.mrb[8].mxu0  ;;  %v478_v46 = vpack.c.bf16 %v895_v43, %v891_v41 }
 0x10a   : > { %v439_v47 = vadd.f32 %v820_v45, %v734_v24  ;;  %v430_v48 = vpop.f32.mrb[9].mxu0  ;;  %v477_v49 = vpack.c.bf16 %v897_v44, %v893_v42 }
 0x10b   : > { %v431_v50 = vadd.f32 %v734_v24, %v430_v48  ;;  %v821_v51 = vpop.f32.mrb[10].mxu0 }
 0x10c   : > { %906 = vtanh.f32 %v439_v47  ;;  %v442_v52 = vadd.f32 %v821_v51, %v734_v24  ;;  %v433_v53 = vpop.f32.mrb[11].mxu0  ;;  %842 = vmatprep.mubr.bf16.mxu1 %v477_v49 }
 0x10d   : > { %908 = vtanh.f32 %v431_v50  ;;  %v434_v54 = vadd.f32 %v734_v24, %v433_v53  ;;  %843 = vmatmul.mubr.bf16.vlgmr.msra.gmra.mrb[0].mxu1 %v478_v46 }
 0x10e   : > { %v899_v55 = vpop.eup %898  ;;  %910 = vtanh.f32 %v442_v52 }
 0x10f   : > { %v901_v56 = vpop.eup %900  ;;  %912 = vtanh.f32 %v434_v54 }
 0x110   : > { %v903_v57 = vpop.eup %902 }
 0x111   : > { %v905_v58 = vpop.eup %904  ;;  %v824_v59 = vpop.f32.mrb[12].mxu0  ;;  %v480_v60 = vpack.c.bf16 %v903_v57, %v899_v55 }
 0x112   : > { %v455_v61 = vadd.f32 %v824_v59, %v734_v24  ;;  %v446_v62 = vpop.f32.mrb[13].mxu0  ;;  %v479_v63 = vpack.c.bf16 %v905_v58, %v901_v56 }
 0x113   : > { %v447_v0 = vadd.f32 %v734_v24, %v446_v62  ;;  %v825_v1 = vpop.f32.mrb[14].mxu0 }
 0x114   : > { %914 = vtanh.f32 %v455_v61  ;;  %v458_v2 = vadd.f32 %v825_v1, %v734_v24  ;;  %v449_v3 = vpop.f32.mrb[15].mxu0  ;;  %846 = vmatprep.mubr.bf16.mxu1 %v479_v63 }
 0x115   : > { %916 = vtanh.f32 %v447_v0  ;;  %v450_v4 = vadd.f32 %v734_v24, %v449_v3  ;;  %847 = vmatmul.mubr.bf16.gmra.mrb[4].mxu1 %v480_v60 }
 0x116   : > { %v907_v5 = vpop.eup %906  ;;  %918 = vtanh.f32 %v458_v2 }
 0x117   : > { %v909_v6 = vpop.eup %908  ;;  %920 = vtanh.f32 %v450_v4 }
 0x118   : > { %v911_v7 = vpop.eup %910 }
 0x119   : > { %v913_v8 = vpop.eup %912  ;;  %v482_v9 = vpack.c.bf16 %v911_v7, %v907_v5 }
 0x11a   : > { %v481_v10 = vpack.c.bf16 %v913_v8, %v909_v6 }
 0x11c   : > { %850 = vmatprep.mubr.bf16.mxu1 %v481_v10 }
 0x11d   : > { %851 = vmatmul.mubr.bf16.gmra.mrb[8].mxu1 %v482_v9 }
 0x11e   : > { %v915_v11 = vpop.eup %914 }
 0x11f   : > { %v917_v12 = vpop.eup %916 }
 0x120   : > { %v919_v13 = vpop.eup %918 }
 0x121   : > { %v921_v14 = vpop.eup %920  ;;  %v484_v15 = vpack.c.bf16 %v919_v13, %v915_v11 }
 0x122   : > { %v483_v16 = vpack.c.bf16 %v921_v14, %v917_v12 }
 0x124   : > { %854 = vmatprep.mubr.bf16.mxu1 %v483_v16 }
 0x125   : > { %855 = vmatmul.mubr.bf16.gmra.mrb[12].mxu1 %v484_v15 }
 0x1e0   : > { %v844_v18 = vpop.f32.mrb[0].mxu1 }
 0x1e1   : > { %v599_v19 = vadd.f32 %v844_v18, %v751_v17  ;;  %v590_v20 = vpop.f32.mrb[1].mxu1 }
 0x1e2   : > { %v591_v21 = vadd.f32 %v751_v17, %v590_v20  ;;  %v845_v22 = vpop.f32.mrb[2].mxu1 }
 0x1e3   : > { %655 = vst [vmem:[%s1042_s16 + $0x10] sm:$0xff] %v599_v19  ;;  %v602_v23 = vadd.f32 %v845_v22, %v751_v17  ;;  %v593_v24 = vpop.f32.mrb[3].mxu1 }
 0x1e4   : > { %653 = vst [vmem:[%s1042_s16] sm:$0xff] %v591_v21  ;;  %v594_v25 = vadd.f32 %v751_v17, %v593_v24 }
 0x1e5   : > { %656 = vst [vmem:[%s1042_s16 + $0x18] sm:$0xff] %v602_v23 }
 0x1e6   : > { %654 = vst [vmem:[%s1042_s16 + $0x8] sm:$0xff] %v594_v25 }
 0x1e8   : > { %v848_v26 = vpop.f32.mrb[4].mxu1 }
 0x1e9   : > { %v615_v27 = vadd.f32 %v848_v26, %v751_v17  ;;  %v606_v28 = vpop.f32.mrb[5].mxu1 }
 0x1ea   : > { %v607_v29 = vadd.f32 %v751_v17, %v606_v28  ;;  %v849_v30 = vpop.f32.mrb[6].mxu1 }
 0x1eb   : > { %659 = vst [vmem:[%s1042_s16 + $0x30] sm:$0xff] %v615_v27  ;;  %v618_v31 = vadd.f32 %v849_v30, %v751_v17  ;;  %v609_v32 = vpop.f32.mrb[7].mxu1 }
 0x1ec   : > { %657 = vst [vmem:[%s1042_s16 + $0x20] sm:$0xff] %v607_v29  ;;  %v610_v33 = vadd.f32 %v751_v17, %v609_v32 }
 0x1ed   : > { %660 = vst [vmem:[%s1042_s16 + $0x38] sm:$0xff] %v618_v31 }
 0x1ee   : > { %658 = vst [vmem:[%s1042_s16 + $0x28] sm:$0xff] %v610_v33 }
 0x1f0   : > { %v852_v34 = vpop.f32.mrb[8].mxu1 }
 0x1f1   : > { %v631_v35 = vadd.f32 %v852_v34, %v751_v17  ;;  %v622_v36 = vpop.f32.mrb[9].mxu1 }
 0x1f2   : > { %v623_v37 = vadd.f32 %v751_v17, %v622_v36  ;;  %v853_v38 = vpop.f32.mrb[10].mxu1 }
 0x1f3   : > { %663 = vst [vmem:[%s1042_s16 + $0x50] sm:$0xff] %v631_v35  ;;  %v634_v39 = vadd.f32 %v853_v38, %v751_v17  ;;  %v625_v40 = vpop.f32.mrb[11].mxu1 }
 0x1f4   : > { %661 = vst [vmem:[%s1042_s16 + $0x40] sm:$0xff] %v623_v37  ;;  %v626_v41 = vadd.f32 %v751_v17, %v625_v40 }
 0x1f5   : > { %664 = vst [vmem:[%s1042_s16 + $0x58] sm:$0xff] %v634_v39 }
 0x1f6   : > { %662 = vst [vmem:[%s1042_s16 + $0x48] sm:$0xff] %v626_v41 }
 0x1f8   : > { %v856_v42 = vpop.f32.mrb[12].mxu1 }
 0x1f9   : > { %v647_v43 = vadd.f32 %v856_v42, %v751_v17  ;;  %v638_v44 = vpop.f32.mrb[13].mxu1 }
 0x1fa   : > { %v639_v45 = vadd.f32 %v751_v17, %v638_v44  ;;  %v857_v46 = vpop.f32.mrb[14].mxu1 }
 0x1fb   : > { %667 = vst [vmem:[%s1042_s16 + $0x70] sm:$0xff] %v647_v43  ;;  %v650_v47 = vadd.f32 %v857_v46, %v751_v17  ;;  %v641_v48 = vpop.f32.mrb[15].mxu1 }
 0x1fc   : > { %665 = vst [vmem:[%s1042_s16 + $0x60] sm:$0xff] %v639_v45  ;;  %v642_v49 = vadd.f32 %v751_v17, %v641_v48 }
 0x1fd   : > { %668 = vst [vmem:[%s1042_s16 + $0x78] sm:$0xff] %v650_v47 }
 0x1fe   : > { %666 = vst [vmem:[%s1042_s16 + $0x68] sm:$0xff] %v642_v49 }
 0x1ff PF: > { %s15_s18 = sadd.s32 1, %s928_s18  }
 0x200   : > { %p12_p4 = scmp.ge.s32.totalorder %s15_s18, 4  }
 0x202   :  { %14 = sbr.rel (!%p12_p4) target bundleno = 1 (0x1), region = 70 }

</bundles_post_ra>
